<compile_context>
chip_gen: v6e
topology: v6e:2x2x1
jax: 0.10.0
libtpu: 0.0.40
codegen_flags: <defaults>
</compile_context>

<pallas_src>
import jax
import jax.numpy as jnp
from jax.experimental import pallas as pl
from jax.experimental.pallas import tpu as pltpu

LANE = 128          # hidden-dim padding target: one 128-lane vreg width
MAX_TILE_B = 2048   # batch rows per grid step (activations are narrow, so
                    # even on v5e's 16 MiB scoped VMEM this is tiny)


# ---------------------------------------------------------------------------
# Kernel
# ---------------------------------------------------------------------------
def critic_kernel(s_ref, a_ref, w1s_ref, w1a_ref, b1_ref,
                  w2_ref, b2_ref, w3_ref, b3_ref, o_ref):
    # Layer 1: tanh(cat([s, a]) @ W1 + b1), with the concat fused into two
    # MXU dots (Mosaic pads the small contraction dims internally).
    h = jnp.dot(s_ref[...], w1s_ref[...], preferred_element_type=jnp.float32)
    h = h + jnp.dot(a_ref[...], w1a_ref[...], preferred_element_type=jnp.float32)
    h = jnp.tanh(h + b1_ref[...])

    # Layer 2: sigmoid(h @ W2 + b2)
    h = jnp.dot(h, w2_ref[...], preferred_element_type=jnp.float32)
    h = jax.nn.sigmoid(h + b2_ref[...])

    # Layer 3: linear (raw value output).  Padded lanes of h are
    # sigmoid(0)=0.5 and are cancelled only because the padded rows of W3
    # are exactly zero (see invariant at top of file).
    o = jnp.dot(h, w3_ref[...], preferred_element_type=jnp.float32) + b3_ref[...]
    o_ref[...] = o.astype(o_ref.dtype)


# ---------------------------------------------------------------------------
# Host-side helpers
# ---------------------------------------------------------------------------
def _pad2d(x, rows, cols):
    r, c = x.shape
    return jnp.pad(x, ((0, rows - r), (0, cols - c)))


def _choose_batch_tiling(B):
    """tile_b multiple of 8, >=2 grid steps when B allows (v7x megacore),
    and tile sized so B_pad - B stays small for unlucky batch sizes."""
    n_tiles = pl.cdiv(B, MAX_TILE_B)
    if B > 8:
        n_tiles = max(n_tiles, 2)
    tile_b = max(8, ((pl.cdiv(B, n_tiles) + 7) // 8) * 8)
    grid = pl.cdiv(B, tile_b)
    return tile_b, grid, grid * tile_b


def pad_params(raw_params, s_dim, a_dim):
    """One-time conversion of raw [in, out] weights into kernel-ready padded
    tensors.  Call once at init, reuse every forward."""
    w1, b1, w2, b2, w3, b3 = raw_params
    in_features, hidden = w1.shape
    out_features = w3.shape[1]
    assert in_features == s_dim + a_dim
    assert hidden <= LANE and out_features <= LANE

    w1s = _pad2d(w1[:s_dim], s_dim, LANE)        # [s_dim, 128]
    w1a = _pad2d(w1[s_dim:], a_dim, LANE)        # [a_dim, 128]
    b1p = _pad2d(b1, 1, LANE)                    # [1, 128] (pad lanes = 0)
    w2p = _pad2d(w2, LANE, LANE)                 # [128, 128]
    b2p = _pad2d(b2, 1, LANE)                    # [1, 128] (pad lanes = 0)
    w3p = _pad2d(w3, LANE, out_features)         # [128, out] (pad rows = 0!)
    b3p = b3                                     # [1, out]
    return w1s, w1a, b1p, w2p, b2p, w3p, b3p


def _critic_forward_impl(s, a, w1s, w1a, b1, w2, b2, w3, b3):
    """s: [B, s_dim], a: [B, a_dim]; weights already padded via pad_params."""
    B, s_dim = s.shape
    a_dim = a.shape[1]
    out_features = w3.shape[1]

    tile_b, grid_steps, b_pad = _choose_batch_tiling(B)

    # Only the batch axis is padded; padded rows produce garbage that is
    # trimmed by the [:B] slice below (do not drop that slice).
    s_p = _pad2d(s.astype(jnp.float32), b_pad, s_dim)
    a_p = _pad2d(a.astype(jnp.float32), b_pad, a_dim)

    def const(shape):
        # Constant index_map: block stays resident in VMEM across the grid.
        return pl.BlockSpec(shape, lambda i: (0, 0))

    out = pl.pallas_call(
        critic_kernel,
        out_shape=jax.ShapeDtypeStruct((b_pad, out_features), jnp.float32),
        grid=(grid_steps,),
        in_specs=[
            pl.BlockSpec((tile_b, s_dim), lambda i: (i, 0)),   # s (true width)
            pl.BlockSpec((tile_b, a_dim), lambda i: (i, 0)),   # a (true width)
            const((s_dim, LANE)),                              # W1_s
            const((a_dim, LANE)),                              # W1_a
            const((1, LANE)),                                  # b1
            const((LANE, LANE)),                               # W2
            const((1, LANE)),                                  # b2
            const((LANE, out_features)),                       # W3
            const((1, out_features)),                          # b3
        ],
        out_specs=pl.BlockSpec((tile_b, out_features), lambda i: (i, 0)),
        compiler_params=pltpu.CompilerParams(
            dimension_semantics=("parallel",),
        ),
    )(s_p, a_p, w1s, w1a, b1, w2, b2, w3, b3)

    return out[:B]


# jit so pad + pallas_call + slice fuse into a single dispatch (dominant cost
# at small batch sizes).
critic_forward = jax.jit(_critic_forward_impl)


# ---------------------------------------------------------------------------
# Parameter init (mirrors the PyTorch module: weight.data.normal_(0, 0.1),
# biases keep nn.Linear's default U(-1/sqrt(fan_in), +1/sqrt(fan_in))).
# Raw weights are stored transposed: [in_features, out_features].
# ---------------------------------------------------------------------------
def init_params(key, input_size, hidden_size, output_size):
    ks = jax.random.split(key, 6)

    def w(k, fi, fo):
        return (0.1 * jax.random.normal(k, (fi, fo))).astype(jnp.float32)

    def b(k, fi, fo):
        bound = 1.0 / (fi ** 0.5)
        return jax.random.uniform(k, (1, fo), minval=-bound, maxval=bound).astype(jnp.float32)

    w1 = w(ks[0], input_size, hidden_size)
    b1 = b(ks[1], input_size, hidden_size)
    w2 = w(ks[2], hidden_size, hidden_size)
    b2 = b(ks[3], hidden_size, hidden_size)
    w3 = w(ks[4], hidden_size, output_size)
    b3 = b(ks[5], hidden_size, output_size)
    return w1, b1, w2, b2, w3, b3


if __name__ == "__main__":
    key = jax.random.PRNGKey(0)
    k_s, k_a, k_p = jax.random.split(key, 3)

    batch = 8
    s_dim = 12
    a_dim = 4
    input_size = s_dim + a_dim
    hidden_size = 32
    output_size = 1

    s = jax.random.normal(k_s, (batch, s_dim), dtype=jnp.float32)
    a = jax.random.normal(k_a, (batch, a_dim), dtype=jnp.float32)

    raw_params = init_params(k_p, input_size, hidden_size, output_size)
    padded_params = pad_params(raw_params, s_dim, a_dim)   # once, at init

    out = critic_forward(s, a, *padded_params)
    out = jax.block_until_ready(out)

    # Pure-JAX reference check (exact Critic forward semantics, raw weights).
    w1, b1, w2, b2, w3, b3 = raw_params
    x = jnp.concatenate([s, a], axis=1)
    ref = jnp.tanh(x @ w1 + b1)
    ref = jax.nn.sigmoid(ref @ w2 + b2)
    ref = ref @ w3 + b3

    assert out.shape == (batch, output_size), out.shape
    assert jnp.allclose(out, ref, atol=1e-5, rtol=1e-5), float(jnp.max(jnp.abs(out - ref)))

    print("KERNEL_OK")
</pallas_src>

<mosaic_0001>
module attributes {stable_mosaic.version = 11 : i64} {
  func.func @critic_kernel(%arg0: i32, %arg1: memref<8x12xf32, #tpu.memory_space<vmem>>, %arg2: memref<8x4xf32, #tpu.memory_space<vmem>>, %arg3: memref<12x128xf32, #tpu.memory_space<vmem>>, %arg4: memref<4x128xf32, #tpu.memory_space<vmem>>, %arg5: memref<1x128xf32, #tpu.memory_space<vmem>>, %arg6: memref<128x128xf32, #tpu.memory_space<vmem>>, %arg7: memref<1x128xf32, #tpu.memory_space<vmem>>, %arg8: memref<128x1xf32, #tpu.memory_space<vmem>>, %arg9: memref<1x1xf32, #tpu.memory_space<vmem>>, %arg10: memref<8x1xf32, #tpu.memory_space<vmem>>) attributes {dimension_semantics = [#tpu.dimension_semantics<parallel>], iteration_bounds = array<i64: 1>, scalar_prefetch = 0 : i64, scratch_operands = 0 : i64, tpu.core_type = #tpu.core_type<tc>, window_params = [{transform_indices = @transform_0, window_bounds = array<i64: 8, 12>}, {transform_indices = @transform_1, window_bounds = array<i64: 8, 4>}, {pipeline_mode = #tpu.pipeline_mode<synchronous>, transform_indices = @transform_2, window_bounds = array<i64: 12, 128>}, {pipeline_mode = #tpu.pipeline_mode<synchronous>, transform_indices = @transform_3, window_bounds = array<i64: 4, 128>}, {pipeline_mode = #tpu.pipeline_mode<synchronous>, transform_indices = @transform_4, window_bounds = array<i64: 1, 128>}, {pipeline_mode = #tpu.pipeline_mode<synchronous>, transform_indices = @transform_5, window_bounds = array<i64: 128, 128>}, {pipeline_mode = #tpu.pipeline_mode<synchronous>, transform_indices = @transform_6, window_bounds = array<i64: 1, 128>}, {pipeline_mode = #tpu.pipeline_mode<synchronous>, transform_indices = @transform_7, window_bounds = array<i64: 128, 1>}, {pipeline_mode = #tpu.pipeline_mode<synchronous>, transform_indices = @transform_8, window_bounds = array<i64: 1, 1>}, {transform_indices = @transform_9, window_bounds = array<i64: 8, 1>}]} {
    %c0 = arith.constant 0 : index
    %c0_0 = arith.constant 0 : index
    %0 = vector.load %arg1[%c0, %c0_0] : memref<8x12xf32, #tpu.memory_space<vmem>>, vector<8x12xf32>
    %c0_1 = arith.constant 0 : index
    %c0_2 = arith.constant 0 : index
    %1 = vector.load %arg3[%c0_1, %c0_2] : memref<12x128xf32, #tpu.memory_space<vmem>>, vector<12x128xf32>
    %cst = arith.constant dense<0.000000e+00> : vector<8x128xf32>
    %2 = tpu.matmul %0, %1, %cst {dimension_numbers = #tpu.dot_dimension_numbers<[1], [0], [0], [1], [0, 0, 1, 1], [], []>} : vector<8x12xf32>, vector<12x128xf32>, vector<8x128xf32> -> vector<8x128xf32>
    %c0_3 = arith.constant 0 : index
    %c0_4 = arith.constant 0 : index
    %3 = vector.load %arg2[%c0_3, %c0_4] : memref<8x4xf32, #tpu.memory_space<vmem>>, vector<8x4xf32>
    %c0_5 = arith.constant 0 : index
    %c0_6 = arith.constant 0 : index
    %4 = vector.load %arg4[%c0_5, %c0_6] : memref<4x128xf32, #tpu.memory_space<vmem>>, vector<4x128xf32>
    %cst_7 = arith.constant dense<0.000000e+00> : vector<8x128xf32>
    %5 = tpu.matmul %3, %4, %cst_7 {dimension_numbers = #tpu.dot_dimension_numbers<[1], [0], [0], [1], [0, 0, 1, 1], [], []>} : vector<8x4xf32>, vector<4x128xf32>, vector<8x128xf32> -> vector<8x128xf32>
    %6 = arith.addf %2, %5 : vector<8x128xf32>
    %c0_8 = arith.constant 0 : index
    %c0_9 = arith.constant 0 : index
    %7 = vector.load %arg5[%c0_8, %c0_9] : memref<1x128xf32, #tpu.memory_space<vmem>>, vector<1x128xf32>
    %8 = vector.broadcast %7 : vector<1x128xf32> to vector<8x128xf32>
    %9 = arith.addf %6, %8 : vector<8x128xf32>
    %10 = math.tanh %9 : vector<8x128xf32>
    %c0_10 = arith.constant 0 : index
    %c0_11 = arith.constant 0 : index
    %11 = vector.load %arg6[%c0_10, %c0_11] : memref<128x128xf32, #tpu.memory_space<vmem>>, vector<128x128xf32>
    %cst_12 = arith.constant dense<0.000000e+00> : vector<8x128xf32>
    %12 = tpu.matmul %10, %11, %cst_12 {dimension_numbers = #tpu.dot_dimension_numbers<[1], [0], [0], [1], [0, 0, 1, 1], [], []>} : vector<8x128xf32>, vector<128x128xf32>, vector<8x128xf32> -> vector<8x128xf32>
    %c0_13 = arith.constant 0 : index
    %c0_14 = arith.constant 0 : index
    %13 = vector.load %arg7[%c0_13, %c0_14] : memref<1x128xf32, #tpu.memory_space<vmem>>, vector<1x128xf32>
    %14 = vector.broadcast %13 : vector<1x128xf32> to vector<8x128xf32>
    %15 = arith.addf %12, %14 : vector<8x128xf32>
    %16 = arith.negf %15 : vector<8x128xf32>
    %17 = math.exp %16 : vector<8x128xf32>
    %cst_15 = arith.constant 1.000000e+00 : f32
    %18 = vector.broadcast %cst_15 : f32 to vector<8x128xf32>
    %19 = arith.addf %18, %17 : vector<8x128xf32>
    %20 = arith.divf %18, %19 : vector<8x128xf32>
    %c0_16 = arith.constant 0 : index
    %c0_17 = arith.constant 0 : index
    %21 = vector.load %arg8[%c0_16, %c0_17] : memref<128x1xf32, #tpu.memory_space<vmem>>, vector<128x1xf32>
    %cst_18 = arith.constant dense<0.000000e+00> : vector<8x1xf32>
    %22 = tpu.matmul %20, %21, %cst_18 {dimension_numbers = #tpu.dot_dimension_numbers<[1], [0], [0], [1], [0, 0, 1, 1], [], []>} : vector<8x128xf32>, vector<128x1xf32>, vector<8x1xf32> -> vector<8x1xf32>
    %c0_19 = arith.constant 0 : index
    %c0_20 = arith.constant 0 : index
    %23 = vector.load %arg9[%c0_19, %c0_20] : memref<1x1xf32, #tpu.memory_space<vmem>>, vector<1x1xf32>
    %24 = vector.broadcast %23 : vector<1x1xf32> to vector<8x1xf32>
    %25 = arith.addf %22, %24 : vector<8x1xf32>
    %c0_21 = arith.constant 0 : index
    %c0_22 = arith.constant 0 : index
    %26 = vector.load %arg10[%c0_21, %c0_22] : memref<8x1xf32, #tpu.memory_space<vmem>>, vector<8x1xf32>
    tpu.vector_store %arg10[%c0_21, %c0_22], %25 {strides = array<i32>} : memref<8x1xf32, #tpu.memory_space<vmem>>, vector<8x1xf32>,
    return
  }
  func.func @transform_0(%arg0: i32) -> (i32, i32) {
    %c0_i32 = arith.constant 0 : i32
    %c0_i32_0 = arith.constant 0 : i32
    return %arg0, %c0_i32 : i32, i32
  }
  func.func @transform_1(%arg0: i32) -> (i32, i32) {
    %c0_i32 = arith.constant 0 : i32
    %c0_i32_0 = arith.constant 0 : i32
    return %arg0, %c0_i32 : i32, i32
  }
  func.func @transform_2(%arg0: i32) -> (i32, i32) {
    %c0_i32 = arith.constant 0 : i32
    %c0_i32_0 = arith.constant 0 : i32
    %c0_i32_1 = arith.constant 0 : i32
    return %c0_i32, %c0_i32_0 : i32, i32
  }
  func.func @transform_3(%arg0: i32) -> (i32, i32) {
    %c0_i32 = arith.constant 0 : i32
    %c0_i32_0 = arith.constant 0 : i32
    %c0_i32_1 = arith.constant 0 : i32
    return %c0_i32, %c0_i32_0 : i32, i32
  }
  func.func @transform_4(%arg0: i32) -> (i32, i32) {
    %c0_i32 = arith.constant 0 : i32
    %c0_i32_0 = arith.constant 0 : i32
    %c0_i32_1 = arith.constant 0 : i32
    return %c0_i32, %c0_i32_0 : i32, i32
  }
  func.func @transform_5(%arg0: i32) -> (i32, i32) {
    %c0_i32 = arith.constant 0 : i32
    %c0_i32_0 = arith.constant 0 : i32
    %c0_i32_1 = arith.constant 0 : i32
    return %c0_i32, %c0_i32_0 : i32, i32
  }
  func.func @transform_6(%arg0: i32) -> (i32, i32) {
    %c0_i32 = arith.constant 0 : i32
    %c0_i32_0 = arith.constant 0 : i32
    %c0_i32_1 = arith.constant 0 : i32
    return %c0_i32, %c0_i32_0 : i32, i32
  }
  func.func @transform_7(%arg0: i32) -> (i32, i32) {
    %c0_i32 = arith.constant 0 : i32
    %c0_i32_0 = arith.constant 0 : i32
    %c0_i32_1 = arith.constant 0 : i32
    return %c0_i32, %c0_i32_0 : i32, i32
  }
  func.func @transform_8(%arg0: i32) -> (i32, i32) {
    %c0_i32 = arith.constant 0 : i32
    %c0_i32_0 = arith.constant 0 : i32
    %c0_i32_1 = arith.constant 0 : i32
    return %c0_i32, %c0_i32_0 : i32, i32
  }
  func.func @transform_9(%arg0: i32) -> (i32, i32) {
    %c0_i32 = arith.constant 0 : i32
    %c0_i32_0 = arith.constant 0 : i32
    return %arg0, %c0_i32 : i32, i32
  }
}

</mosaic_0001>

<bundles_post_ra>
// kernel: _critic_forward_impl.1
= control target key start
LH: loop header
LB: loop body
LE: loop exit
PB: predicated region body
PF: predicated region fallthrough
CT: control target
= control target key end

     0   :  { %s863_s0 = inlined_call_operand.vmem [shape: f32[8,12], index: 0, kind: input, shape index: {}]   ;;  %s864_s1 = inlined_call_operand.vmem [shape: f32[8,4], index: 1, kind: input, shape index: {}]   ;;  %s865_s2 = inlined_call_operand.vmem [shape: f32[12,128], index: 2, kind: input, shape index: {}]   ;;  %s866_s3 = inlined_call_operand.hbm [shape: f32[4,128], index: 3, kind: input, shape index: {}]   ;;  %s867_s4 = inlined_call_operand.hbm [shape: f32[1,128], index: 4, kind: input, shape index: {}]   ;;  %s868_s5 = inlined_call_operand.vmem [shape: f32[128,128], index: 5, kind: input, shape index: {}]   ;;  %s869_s6 = inlined_call_operand.hbm [shape: f32[1,128], index: 6, kind: input, shape index: {}]   ;;  %s870_s7 = inlined_call_operand.vmem [shape: f32[128,1], index: 7, kind: input, shape index: {}]   ;;  %s871_s8 = inlined_call_operand.<no memory space> [shape: f32[1,1], index: 8, kind: input, shape index: {}]   ;;  %s872_s9 = inlined_call_operand.vmem [shape: f32[8,1], index: 9, kind: output, shape index: {}]  }
   0x1   :  { %v14_v0 = vstv %s871_s8 }
   0x2   :  { %15 = vst [vmem:[#allocation2] sm:$0x1] %v14_v0 }
   0x3   :  { %16 = vsyncpa [#allocation4], 0 }
   0x4   :  { %17 = vsyncpa [#allocation6], 0  ;;  %s642_s11 = smov [#allocation5]   ;;  %s643_s13 = smov [#allocation3]  }
   0x5   :  { %s40_s12 = sshll.u32 %s642_s11, 4  ;;  %s30_s14 = sshll.u32 %s643_s13, 4  ;;  %s41_s12 = int_to_ptr.vmem [resolvable:$true] %s40_s12  ;;  %s31_s14 = int_to_ptr.vmem [resolvable:$true] %s30_s14 }
   0x6   :  { %s586_s15 = scalar_lea.vmem %s41_s12, 16  ;;  %s590_s16 = scalar_lea.vmem %s41_s12, 32 }
   0x7   :  { %p587_p0 = scmp.ne.s32.totalorder %s41_s12, %s586_s15  ;;  %p591_p1 = scmp.lt.s32.totalorder %s41_s12, %s41_s12 }
   0x8   :  { %p592_p2 = scmp.lt.s32.totalorder %s590_s16, %s586_s15 }
   0xa   :  { %p593_p3 = por %p592_p2, %p591_p1 }
   0xc   :  { %p594_p4 = pnand %p593_p3, %p587_p0 }
   0xe   :  { %597 = shalt.err (!%p594_p4)
}
   0xf   :  { %43 = dma.hbm_to_vmem [thread:$0]  %s867_s4, 16, %s41_s12, [#allocation6]  }
  0x10   :  { %s606_s8 = scalar_lea.vmem %s31_s14, 64  ;;  %p611_p6 = scmp.lt.s32.totalorder %s31_s14, %s31_s14 }
  0x11   :  { %p607_p5 = scmp.ne.s32.totalorder %s31_s14, %s606_s8  ;;  %p612_p7 = scmp.lt.s32.totalorder %s606_s8, %s606_s8 }
  0x13   :  { %p613_p8 = por %p612_p7, %p611_p6 }
  0x15   :  { %p614_p9 = pnand %p613_p8, %p607_p5 }
  0x17   :  { %617 = shalt.err (!%p614_p9)
}
  0x18   :  { %33 = dma.hbm_to_vmem [thread:$0]  %s866_s3, 64, %s31_s14, [#allocation4]  }
  0x19   :  { %s644_s21 = smov [#allocation7]  }
  0x1a   :  { %s52_s22 = sshll.u32 %s644_s21, 4  ;;  %s53_s22 = int_to_ptr.vmem [resolvable:$true] %s52_s22 }
  0x1b   :  { %s626_s23 = scalar_lea.vmem %s53_s22, 16  ;;  %s630_s24 = scalar_lea.vmem %s53_s22, 32 }
  0x1c   :  { %p627_p10 = scmp.ne.s32.totalorder %s53_s22, %s626_s23  ;;  %p631_p11 = scmp.lt.s32.totalorder %s53_s22, %s53_s22 }
  0x1d   :  { %p632_p12 = scmp.lt.s32.totalorder %s630_s24, %s626_s23 }
  0x1f   :  { %p633_p13 = por %p632_p12, %p631_p11 }
  0x21   :  { %p634_p0 = pnand %p633_p13, %p627_p10 }
  0x23   :  { %637 = shalt.err (!%p634_p0)
}
  0x24   :  { %55 = dma.hbm_to_vmem [thread:$0]  %s869_s6, 16, %s53_s22, [#allocation6]  }
  0x25   :  { %638 = dma.done.wait [#allocation4], 64  }
  0x26   :  { %639 = vsyncadd [#allocation4], 4294967232 }
  0x27   :  { %640 = dma.done.wait [#allocation6], 32  }
  0x28   :  { %641 = vsyncadd [#allocation6], 4294967264  ;;  %v645_v1 = vmov 0.0   ;;  %vm646_vm0 = vmmov 0   ;;  %vm78_vm1 = vcmask 1043456   ;;  %vm74_vm2 = vcmask 31744  }
  0x29   :  { %485 = vmatprep.subr.mxu0 %v645_v1  ;;  %490 = vmatprep.subr.mxu1 %v645_v1  ;;  %v73_v2 = vld [vmem:[#allocation3] sm:$0xf]  ;;  %v71_v3 = vld [vmem:[%s865_s2 + $0x8] sm:$0xf]  ;;  %vm152_vm3 = vcmask 97280   ;;  %v253_v7 = vld [vmem:[%s868_s5 + $0x78] sm:$0xff] }
  0x2a   :  { %487 = vmatprep.mubr.msk.f32.mxu0 %vm646_vm0, %v645_v1  ;;  %494 = vmatprep.mubr.msk.f32.mxu1 %vm646_vm0, %v645_v1  ;;  %v72_v4 = vld [vmem:[%s864_s1] sm:$0xff]  ;;  %v252_v8 = vld [vmem:[%s868_s5 + $0x70] sm:$0xff]  ;;  %v251_v9 = vld [vmem:[%s868_s5 + $0x68] sm:$0xff]  ;;  %vm430_vm4 = vcmask 7168  }
  0x2b   :  { %486 = vmatpush3.msk.msra.mxu0 %vm78_vm1, %v73_v2  ;;  %491 = vmatpush3.msk.msra.mxu1 %vm78_vm1, %v71_v3  ;;  %v70_v5 = vld [vmem:[%s865_s2] sm:$0xff]  ;;  %v249_v11 = vld [vmem:[%s868_s5 + $0x58] sm:$0xff]  ;;  %v248_v12 = vld [vmem:[%s868_s5 + $0x50] sm:$0xff] }
  0x2c   :  { %v69_v6 = vld [vmem:[%s863_s0] sm:$0xff]  ;;  %488 = vmatmul.mubr.msk.f32.vlgmr.msra.gmra.mxu0 %vm74_vm2, %v72_v4  ;;  %492 = vmatprep.subr.mxu1 %v645_v1  ;;  %v247_v13 = vld [vmem:[%s868_s5 + $0x48] sm:$0xff]  ;;  %v245_v15 = vld [vmem:[%s868_s5 + $0x38] sm:$0xff] }
  0x2d   :  { %493 = vmatpush3.msra.mxu1 %v70_v5  ;;  %497 = vmatprep.subr.mxu0 %v645_v1  ;;  %v250_v10 = vld [vmem:[%s868_s5 + $0x60] sm:$0xff]  ;;  %v244_v16 = vld [vmem:[%s868_s5 + $0x30] sm:$0xff]  ;;  %v243_v17 = vld [vmem:[%s868_s5 + $0x28] sm:$0xff] }
  0x2e   :  { %495 = vmatmul.mubr.msk.f32.vlgmr.msra.gmra.mxu1 %vm152_vm3, %v69_v6  ;;  %498 = vmatpush3.msra.mxu0 %v253_v7  ;;  %v246_v14 = vld [vmem:[%s868_s5 + $0x40] sm:$0xff]  ;;  %v241_v19 = vld [vmem:[%s868_s5 + $0x18] sm:$0xff]  ;;  %v240_v20 = vld [vmem:[%s868_s5 + $0x10] sm:$0xff] }
  0x2f   :  { %499 = vmatprep.subr.mxu0 %v645_v1  ;;  %529 = vmatprep.mubr.msk.f32.mxu0 %vm646_vm0, %v645_v1  ;;  %v242_v18 = vld [vmem:[%s868_s5 + $0x20] sm:$0xff]  ;;  %v239_v21 = vld [vmem:[%s868_s5 + $0x8] sm:$0xff]  ;;  %v352_v31 = vld [vmem:[%s870_s7 + $0x78] sm:$0xff] }
  0x30   :  { %500 = vmatpush3.msra.mxu0 %v252_v8  ;;  %532 = vmatprep.subr.mxu1 %v645_v1  ;;  %v238_v22 = vld [vmem:[%s868_s5] sm:$0xff]  ;;  %v351_v32 = vld [vmem:[%s870_s7 + $0x70] sm:$0xff]  ;;  %v350_v33 = vld [vmem:[%s870_s7 + $0x68] sm:$0xff] }
  0x31   :  { %501 = vmatprep.subr.mxu0 %v645_v1  ;;  %564 = vmatprep.mubr.msk.f32.mxu1 %vm646_vm0, %v645_v1  ;;  %v442_v26 = vld [vmem:[#allocation5] ss:$0 sm:$0xff]  ;;  %v348_v35 = vld [vmem:[%s870_s7 + $0x58] sm:$0xff]  ;;  %v347_v36 = vld [vmem:[%s870_s7 + $0x50] sm:$0xff] }
  0x32   :  { %502 = vmatpush3.msra.mxu0 %v251_v9  ;;  %533 = vmatpush3.msra.mxu1 %v352_v31  ;;  %v349_v34 = vld [vmem:[%s870_s7 + $0x60] sm:$0xff]  ;;  %v346_v37 = vld [vmem:[%s870_s7 + $0x48] sm:$0xff]  ;;  %v344_v39 = vld [vmem:[%s870_s7 + $0x38] sm:$0xff] }
  0x33   :  { %503 = vmatprep.subr.mxu0 %v645_v1  ;;  %534 = vmatprep.subr.mxu1 %v645_v1  ;;  %v345_v38 = vld [vmem:[%s870_s7 + $0x40] sm:$0xff]  ;;  %v343_v40 = vld [vmem:[%s870_s7 + $0x30] sm:$0xff]  ;;  %v342_v41 = vld [vmem:[%s870_s7 + $0x28] sm:$0xff] }
  0x34   :  { %504 = vmatpush3.msra.mxu0 %v250_v10  ;;  %535 = vmatpush3.msra.mxu1 %v351_v32  ;;  %v341_v42 = vld [vmem:[%s870_s7 + $0x20] sm:$0xff]  ;;  %v340_v43 = vld [vmem:[%s870_s7 + $0x18] sm:$0xff]  ;;  %v339_v44 = vld [vmem:[%s870_s7 + $0x10] sm:$0xff] }
  0x35   :  { %505 = vmatprep.subr.mxu0 %v645_v1  ;;  %536 = vmatprep.subr.mxu1 %v645_v1  ;;  %v338_v45 = vld [vmem:[%s870_s7 + $0x8] sm:$0xff]  ;;  %v337_v46 = vld [vmem:[%s870_s7] sm:$0xff] }
  0x36   :  { %506 = vmatpush3.msra.mxu0 %v249_v11  ;;  %537 = vmatpush3.msra.mxu1 %v350_v33  ;;  %v443_v47 = vld [vmem:[#allocation7] ss:$0 sm:$0xff]  ;;  %v445_v55 = vld [vmem:[#allocation2] ss:$0 sm:$0xff] }
  0x37   :  { %507 = vmatprep.subr.mxu0 %v645_v1  ;;  %538 = vmatprep.subr.mxu1 %v645_v1 }
  0x38   :  { %508 = vmatpush3.msra.mxu0 %v248_v12  ;;  %539 = vmatpush3.msra.mxu1 %v349_v34 }
  0x39   :  { %509 = vmatprep.subr.mxu0 %v645_v1  ;;  %540 = vmatprep.subr.mxu1 %v645_v1 }
  0x3a   :  { %510 = vmatpush3.msra.mxu0 %v247_v13  ;;  %541 = vmatpush3.msra.mxu1 %v348_v35 }
  0x3b   :  { %511 = vmatprep.subr.mxu0 %v645_v1  ;;  %542 = vmatprep.subr.mxu1 %v645_v1 }
  0x3c   :  { %512 = vmatpush3.msra.mxu0 %v246_v14  ;;  %543 = vmatpush3.msra.mxu1 %v347_v36 }
  0x3d   :  { %513 = vmatprep.subr.mxu0 %v645_v1  ;;  %544 = vmatprep.subr.mxu1 %v645_v1 }
  0x3e   :  { %514 = vmatpush3.msra.mxu0 %v245_v15  ;;  %545 = vmatpush3.msra.mxu1 %v346_v37 }
  0x3f   :  { %515 = vmatprep.subr.mxu0 %v645_v1  ;;  %546 = vmatprep.subr.mxu1 %v645_v1 }
  0x40   :  { %516 = vmatpush3.msra.mxu0 %v244_v16  ;;  %547 = vmatpush3.msra.mxu1 %v345_v38 }
  0x41   :  { %517 = vmatprep.subr.mxu0 %v645_v1  ;;  %548 = vmatprep.subr.mxu1 %v645_v1 }
  0x42   :  { %518 = vmatpush3.msra.mxu0 %v243_v17  ;;  %549 = vmatpush3.msra.mxu1 %v344_v39 }
  0x43   :  { %519 = vmatprep.subr.mxu0 %v645_v1  ;;  %550 = vmatprep.subr.mxu1 %v645_v1 }
  0x44   :  { %520 = vmatpush3.msra.mxu0 %v242_v18  ;;  %551 = vmatpush3.msra.mxu1 %v343_v40 }
  0x45   :  { %521 = vmatprep.subr.mxu0 %v645_v1  ;;  %552 = vmatprep.subr.mxu1 %v645_v1 }
  0x46   :  { %522 = vmatpush3.msra.mxu0 %v241_v19  ;;  %553 = vmatpush3.msra.mxu1 %v342_v41 }
  0x47   :  { %523 = vmatprep.subr.mxu0 %v645_v1  ;;  %554 = vmatprep.subr.mxu1 %v645_v1 }
  0x48   :  { %524 = vmatpush3.msra.mxu0 %v240_v20  ;;  %555 = vmatpush3.msra.mxu1 %v341_v42 }
  0x49   :  { %525 = vmatprep.subr.mxu0 %v645_v1  ;;  %556 = vmatprep.subr.mxu1 %v645_v1 }
  0x4a   :  { %526 = vmatpush3.msra.mxu0 %v239_v21  ;;  %557 = vmatpush3.msra.mxu1 %v340_v43 }
  0x4b   :  { %527 = vmatprep.subr.mxu0 %v645_v1  ;;  %558 = vmatprep.subr.mxu1 %v645_v1 }
  0x4c   :  { %528 = vmatpush3.msra.mxu0 %v238_v22  ;;  %559 = vmatpush3.msra.mxu1 %v339_v44 }
  0x4d   :  { %560 = vmatprep.subr.mxu1 %v645_v1 }
  0x4e   :  { %561 = vmatpush3.msra.mxu1 %v338_v45 }
  0x4f   :  { %562 = vmatprep.subr.mxu1 %v645_v1 }
  0x50   :  { %563 = vmatpush3.msra.mxu1 %v337_v46 }
  0xec   :  { %v148_v23 = vpop.f32.mrf.mxu0 }
  0xee   :  { %v489_v24 = vpop.f32.mrf.mxu0  ;;  %v225_v25 = vpop.f32.mrf.mxu1 }
  0xef   :  { %v226_v27 = vadd.f32 %v225_v25, %v148_v23 }
  0xf0   :  { %v496_v28 = vpop.f32.mrf.mxu1 }
  0xf1   :  { %v236_v29 = vadd.f32 %v442_v26, %v226_v27 }
  0xf3   :  { %572 = vtanh.f32 %v236_v29 }
 0x100   :  { %v573_v30 = vpop.eup %572 }
 0x101   :  { %530 = vmatmul.mubr.f32.vlgmr.msra.gmra.mxu0 %v573_v30 }
 0x1c1   :  { %v327_v48 = vpop.f32.mrf.mxu0 }
 0x1c2   :  { %v328_v49 = vadd.f32 %v443_v47, %v327_v48 }
 0x1c3   :  { %v531_v50 = vpop.f32.mrf.mxu0 }
 0x1c4   :  { %v444_v51 = vmul.f32 -1.442695, %v328_v49 }
 0x1c6   :  { %574 = vpow2.f32 %v444_v51 }
 0x1d3   :  { %v575_v52 = vpop.eup %574 }
 0x1d4   :  { %v334_v53 = vadd.f32 1.0, %v575_v52 }
 0x1d6   :  { %576 = vrcp.f32 %v334_v53 }
 0x1e3   :  { %v577_v54 = vpop.eup %576 }
 0x1e4   :  { %565 = vmatmul.mubr.f32.vlgmr.msra.gmra.mxu1 %v577_v54 }
 0x2a4   :  { %v426_v56 = vpop.f32.mrf.mxu1 }
 0x2a5   :  { %v427_v57 = vadd.f32 %v445_v55, %v426_v56 }
 0x2a6   :  { %v566_v58 = vpop.f32.mrf.mxu1 }
 0x2a7   :  { %431 = vst.msk [vmem:[%s872_s9] sm:$0xff] %vm430_vm4, %v427_v57 }
 0x2a8   :  { %436 = vsyncpa [#allocation4], 1 }
 0x2a9   :  { %437 = vsyncpa [#allocation6], 1 }

</bundles_post_ra>
